<compile_context>
chip_gen: v6e
topology: v6e:2x2x1
jax: 0.10.0
libtpu: 0.0.40
codegen_flags: <defaults>
</compile_context>

<pallas_src>
import jax
import jax.numpy as jnp
from jax.experimental import pallas as pl
from jax.experimental.pallas import tpu as pltpu


def _round_up(x, m):
    return ((x + m - 1) // m) * m


def _make_wce_kernel(B, C, TB, TC, needs_col_mask):
    """Weighted cross-entropy partials over grid (batch tiles, class tiles)."""

    def kernel(logits_ref, labels_ref, weight_ref, out_ref,
               m_ref, l_ref, wy_ref, gy_ref):
        bi = pl.program_id(0)          # batch-tile index ("parallel")
        ci = pl.program_id(1)          # class-tile index (reduction, last)
        nc = pl.num_programs(1)

        # ---- init per-batch-tile running statistics ----
        @pl.when(ci == 0)
        def _():
            m_ref[...] = jnp.full_like(m_ref, -jnp.inf)
            l_ref[...] = jnp.zeros_like(l_ref)
            wy_ref[...] = jnp.zeros_like(wy_ref)
            gy_ref[...] = jnp.zeros_like(gy_ref)

        # Widen per tile (bf16 inputs stream at half HBM traffic); accumulate f32.
        logits = logits_ref[...].astype(jnp.float32)           # [TB, TC]
        labels = labels_ref[...]                                # [TB, 1] int32
        w = weight_ref[...].astype(jnp.float32)                 # [1, TC]

        col = jax.lax.broadcasted_iota(jnp.int32, (1, TC), 1)   # [1, TC]

        # ---- online logsumexp update over class tiles ----
        if needs_col_mask:
            # Only emitted when C % TC != 0: padded class columns hold garbage.
            # Select (not multiply) so NaN/Inf garbage cannot leak.
            logits_m = jnp.where(col < (C - ci * TC), logits, -jnp.inf)
        else:
            logits_m = logits
        tile_max = jnp.max(logits_m, axis=-1, keepdims=True)    # [TB, 1]
        m_prev = m_ref[...]
        m_new = jnp.maximum(m_prev, tile_max)
        l_ref[...] = (l_ref[...] * jnp.exp(m_prev - m_new)
                      + jnp.sum(jnp.exp(logits_m - m_new), axis=-1, keepdims=True))
        m_ref[...] = m_new

        # ---- fused gather of w[y] and logit_y (select-based, relative labels) ----
        sel = col == (labels - ci * TC)                         # [TB, TC] bool
        wy_ref[...] += jnp.sum(jnp.where(sel, w, 0.0), axis=-1, keepdims=True)
        gy_ref[...] += jnp.sum(jnp.where(sel, logits, 0.0), axis=-1, keepdims=True)

        # ---- finalize this batch tile on the last class tile ----
        @pl.when(ci == nc - 1)
        def _():
            lse = m_ref[...] + jnp.log(l_ref[...])              # [TB, 1]
            row = bi * TB + jax.lax.broadcasted_iota(jnp.int32, (TB, 1), 0)
            valid = row < B                                     # padded rows -> 0 (select)
            num = jnp.sum(jnp.where(valid, wy_ref[...] * (lse - gy_ref[...]), 0.0))
            den = jnp.sum(jnp.where(valid, wy_ref[...], 0.0))
            lane = jax.lax.broadcasted_iota(jnp.int32, (1, 8, 128), 2)
            sub = jax.lax.broadcasted_iota(jnp.int32, (1, 8, 128), 1)
            out_ref[...] = jnp.where(
                (sub == 0) & (lane == 0), num,
                jnp.where((sub == 0) & (lane == 1), den, 0.0))

    return kernel


def identification_loss(logits, labels, weight=None, *, block_b=None, block_c=None):
    """JAX/Pallas equivalent of Identification_loss.forward."""
    B, C = logits.shape
    if weight is None:
        weight = jnp.ones((C,), jnp.float32) / C
    else:
        weight = jnp.asarray(weight, jnp.float32)
        assert weight.size == C, "Weight tensor size should match num_classes"

    # One-hot labels -> class indices (mirrors the PyTorch branch).
    # TODO(synk): fuse this argmax into the kernel's class-tile scan to avoid a
    # second full BxC HBM pass when labels arrive one-hot encoded.
    if labels.ndim == 2 and labels.shape[1] == C:
        labels = jnp.argmax(labels, axis=1)
    labels = labels.astype(jnp.int32).reshape(B, 1)
    weight2d = weight.reshape(1, C)

    itemsize = jnp.dtype(logits.dtype).itemsize

    # Class tile: cover the whole class dim in one tile when it fits (nc=1 =>
    # no online-LSE rescale and no column masking); otherwise 8192-wide tiles.
    if block_c is not None:
        TC = block_c
    elif C <= 8192:
        TC = C
    else:
        TC = 8192

    # Batch tile: target ~8 MiB logits tiles (x2 pipeline buffers = 16 MiB),
    # which fits every generation's VMEM (v7x 64 MiB/TC, v5e/v6e 128 MiB).
    if block_b is not None:
        TB = block_b
    else:
        target_bytes = 8 * 1024 * 1024
        tb = max(8, (target_bytes // max(TC * itemsize, 1)) // 8 * 8)
        TB = min(512, int(tb))
        if B < TB:
            TB = B          # full batch dim in one tile (allowed as full-dim block)

    needs_col_mask = (C % TC) != 0
    GB = pl.cdiv(B, TB)
    grid = (GB, pl.cdiv(C, TC))

    tile_bytes = TB * TC * itemsize
    vmem_limit = int(min(48 * 1024 * 1024,
                         max(16 * 1024 * 1024, 3 * tile_bytes + (4 << 20))))

    partials = pl.pallas_call(
        _make_wce_kernel(B, C, TB, TC, needs_col_mask),
        out_shape=jax.ShapeDtypeStruct((GB, 8, 128), jnp.float32),
        grid_spec=pltpu.PrefetchScalarGridSpec(
            num_scalar_prefetch=0,
            grid=grid,
            in_specs=[
                pl.BlockSpec((TB, TC), lambda bi, ci: (bi, ci)),   # logits tile
                pl.BlockSpec((TB, 1), lambda bi, ci: (bi, 0)),     # labels tile
                pl.BlockSpec((1, TC), lambda bi, ci: (0, ci)),     # class weights
            ],
            out_specs=pl.BlockSpec((1, 8, 128), lambda bi, ci: (bi, 0, 0)),
            scratch_shapes=[
                pltpu.VMEM((TB, 1), jnp.float32),   # running max
                pltpu.VMEM((TB, 1), jnp.float32),   # running exp-sum
                pltpu.VMEM((TB, 1), jnp.float32),   # w[y]
                pltpu.VMEM((TB, 1), jnp.float32),   # logit_y
            ],
        ),
        compiler_params=pltpu.CompilerParams(
            dimension_semantics=("parallel", "arbitrary"),
            vmem_limit_bytes=vmem_limit,
        ),
    )(logits, labels, weight2d)

    num = jnp.sum(partials[:, 0, 0])
    den = jnp.sum(partials[:, 0, 1])
    return num / den


def _reference_loss(logits, labels, weight):
    """Pure-JAX reference matching F.cross_entropy(weight=w, reduction='mean')."""
    if labels.ndim == 2 and labels.shape[1] == logits.shape[1]:
        labels = jnp.argmax(labels, axis=1)
    labels = labels.astype(jnp.int32)
    logits = logits.astype(jnp.float32)
    lse = jax.scipy.special.logsumexp(logits, axis=-1)
    logit_y = jnp.take_along_axis(logits, labels[:, None], axis=1)[:, 0]
    w_y = weight[labels]
    return jnp.sum(w_y * (lse - logit_y)) / jnp.sum(w_y)


if __name__ == "__main__":
    key = jax.random.PRNGKey(0)
    k1, k2, k3, k4, k5 = jax.random.split(key, 5)

    # Case 1: small shapes from the module, one-hot labels, default weight.
    B1, C1 = 8, 32
    logits1 = jax.random.normal(k1, (B1, C1), jnp.float32)
    lbl_idx1 = jax.random.randint(k2, (B1,), 0, C1)
    labels1 = jax.nn.one_hot(lbl_idx1, C1, dtype=jnp.float32)
    weight1 = jnp.ones((C1,), jnp.float32) / C1          # default __init__ weight

    loss1 = jax.block_until_ready(identification_loss(logits1, labels1, weight1))
    ref1 = _reference_loss(logits1, labels1, weight1)
    assert jnp.allclose(loss1, ref1, rtol=1e-4, atol=1e-4), (loss1, ref1)

    # Case 2: irregular shapes with forced small tiles -> exercises padded rows,
    # padded class columns, the online logsumexp across class tiles, integer
    # labels and non-uniform class weights.
    B2, C2 = 20, 200
    logits2 = jax.random.normal(k3, (B2, C2), jnp.float32) * 3.0
    labels2 = jax.random.randint(k4, (B2,), 0, C2)
    weight2 = jax.random.uniform(k5, (C2,), jnp.float32, minval=0.1, maxval=1.0)

    loss2 = jax.block_until_ready(
        identification_loss(logits2, labels2, weight2, block_b=8, block_c=128))
    ref2 = _reference_loss(logits2, labels2, weight2)
    assert jnp.allclose(loss2, ref2, rtol=1e-4, atol=1e-4), (loss2, ref2)

    # Case 3: same irregular shapes with the default (single class tile) config.
    loss3 = jax.block_until_ready(identification_loss(logits2, labels2, weight2))
    assert jnp.allclose(loss3, ref2, rtol=1e-4, atol=1e-4), (loss3, ref2)

    print("KERNEL_OK")
</pallas_src>

<mosaic_0001>
module attributes {stable_mosaic.version = 11 : i64} {
  func.func @kernel(%arg0: i32, %arg1: i32, %arg2: memref<8x32xf32, #tpu.memory_space<vmem>>, %arg3: memref<8x1xi32, #tpu.memory_space<vmem>>, %arg4: memref<1x32xf32, #tpu.memory_space<vmem>>, %arg5: memref<1x8x128xf32, #tpu.memory_space<vmem>>, %arg6: memref<8x1xf32, #tpu.memory_space<vmem>>, %arg7: memref<8x1xf32, #tpu.memory_space<vmem>>, %arg8: memref<8x1xf32, #tpu.memory_space<vmem>>, %arg9: memref<8x1xf32, #tpu.memory_space<vmem>>) attributes {dimension_semantics = [#tpu.dimension_semantics<parallel>, #tpu.dimension_semantics<arbitrary>], iteration_bounds = array<i64: 1, 1>, scalar_prefetch = 0 : i64, scratch_operands = 4 : i64, tpu.core_type = #tpu.core_type<tc>, window_params = [{transform_indices = @transform_0, window_bounds = array<i64: 8, 32>}, {transform_indices = @transform_1, window_bounds = array<i64: 8, 1>}, {transform_indices = @transform_2, window_bounds = array<i64: 1, 32>}, {transform_indices = @transform_3, window_bounds = array<i64: 1, 8, 128>}]} {
    %c0_i32 = arith.constant 0 : i32
    %0 = arith.cmpi eq, %arg1, %c0_i32 : i32
    %1 = arith.extui %0 : i1 to i32
    %c0_i32_0 = arith.constant 0 : i32
    %2 = arith.cmpi ne, %1, %c0_i32_0 : i32
    scf.if %2 {
      %cst_29 = arith.constant 0xFF800000 : f32
      %48 = vector.broadcast %cst_29 : f32 to vector<8x1xf32>
      %c0_30 = arith.constant 0 : index
      %c0_31 = arith.constant 0 : index
      %49 = vector.load %arg6[%c0_30, %c0_31] : memref<8x1xf32, #tpu.memory_space<vmem>>, vector<8x1xf32>
      tpu.vector_store %arg6[%c0_30, %c0_31], %48 {strides = array<i32>} : memref<8x1xf32, #tpu.memory_space<vmem>>, vector<8x1xf32>,
      %cst_32 = arith.constant 0.000000e+00 : f32
      %50 = vector.broadcast %cst_32 : f32 to vector<8x1xf32>
      %c0_33 = arith.constant 0 : index
      %c0_34 = arith.constant 0 : index
      %51 = vector.load %arg7[%c0_33, %c0_34] : memref<8x1xf32, #tpu.memory_space<vmem>>, vector<8x1xf32>
      tpu.vector_store %arg7[%c0_33, %c0_34], %50 {strides = array<i32>} : memref<8x1xf32, #tpu.memory_space<vmem>>, vector<8x1xf32>,
      %cst_35 = arith.constant 0.000000e+00 : f32
      %52 = vector.broadcast %cst_35 : f32 to vector<8x1xf32>
      %c0_36 = arith.constant 0 : index
      %c0_37 = arith.constant 0 : index
      %53 = vector.load %arg8[%c0_36, %c0_37] : memref<8x1xf32, #tpu.memory_space<vmem>>, vector<8x1xf32>
      tpu.vector_store %arg8[%c0_36, %c0_37], %52 {strides = array<i32>} : memref<8x1xf32, #tpu.memory_space<vmem>>, vector<8x1xf32>,
      %cst_38 = arith.constant 0.000000e+00 : f32
      %54 = vector.broadcast %cst_38 : f32 to vector<8x1xf32>
      %c0_39 = arith.constant 0 : index
      %c0_40 = arith.constant 0 : index
      %55 = vector.load %arg9[%c0_39, %c0_40] : memref<8x1xf32, #tpu.memory_space<vmem>>, vector<8x1xf32>
      tpu.vector_store %arg9[%c0_39, %c0_40], %54 {strides = array<i32>} : memref<8x1xf32, #tpu.memory_space<vmem>>, vector<8x1xf32>,
    } else {
    }
    %c0 = arith.constant 0 : index
    %c0_1 = arith.constant 0 : index
    %3 = vector.load %arg2[%c0, %c0_1] : memref<8x32xf32, #tpu.memory_space<vmem>>, vector<8x32xf32>
    %c0_2 = arith.constant 0 : index
    %c0_3 = arith.constant 0 : index
    %4 = vector.load %arg3[%c0_2, %c0_3] : memref<8x1xi32, #tpu.memory_space<vmem>>, vector<8x1xi32>
    %c0_4 = arith.constant 0 : index
    %c0_5 = arith.constant 0 : index
    %5 = vector.load %arg4[%c0_4, %c0_5] : memref<1x32xf32, #tpu.memory_space<vmem>>, vector<1x32xf32>
    %6 = tpu.iota {dimensions = array<i32: 1>} : vector<1x32xi32>
    %cst = arith.constant dense<0xFF800000> : vector<8xf32>
    %7 = vector.multi_reduction <maximumf>, %3, %cst [1] : vector<8x32xf32> to vector<8xf32>
    %8 = vector.shape_cast %7 : vector<8xf32> to vector<8x1xf32>
    %c0_6 = arith.constant 0 : index
    %c0_7 = arith.constant 0 : index
    %9 = vector.load %arg6[%c0_6, %c0_7] : memref<8x1xf32, #tpu.memory_space<vmem>>, vector<8x1xf32>
    %10 = arith.maximumf %9, %8 : vector<8x1xf32>
    %c0_8 = arith.constant 0 : index
    %c0_9 = arith.constant 0 : index
    %11 = vector.load %arg7[%c0_8, %c0_9] : memref<8x1xf32, #tpu.memory_space<vmem>>, vector<8x1xf32>
    %12 = arith.subf %9, %10 : vector<8x1xf32>
    %13 = math.exp %12 : vector<8x1xf32>
    %14 = arith.mulf %11, %13 : vector<8x1xf32>
    %15 = vector.broadcast %10 : vector<8x1xf32> to vector<8x32xf32>
    %16 = arith.subf %3, %15 : vector<8x32xf32>
    %17 = math.exp %16 : vector<8x32xf32>
    %cst_10 = arith.constant dense<0.000000e+00> : vector<8xf32>
    %18 = vector.multi_reduction <add>, %17, %cst_10 [1] : vector<8x32xf32> to vector<8xf32>
    %19 = vector.shape_cast %18 : vector<8xf32> to vector<8x1xf32>
    %20 = arith.addf %14, %19 : vector<8x1xf32>
    %c0_11 = arith.constant 0 : index
    %c0_12 = arith.constant 0 : index
    %21 = vector.load %arg7[%c0_11, %c0_12] : memref<8x1xf32, #tpu.memory_space<vmem>>, vector<8x1xf32>
    tpu.vector_store %arg7[%c0_11, %c0_12], %20 {strides = array<i32>} : memref<8x1xf32, #tpu.memory_space<vmem>>, vector<8x1xf32>,
    %c0_13 = arith.constant 0 : index
    %c0_14 = arith.constant 0 : index
    %22 = vector.load %arg6[%c0_13, %c0_14] : memref<8x1xf32, #tpu.memory_space<vmem>>, vector<8x1xf32>
    tpu.vector_store %arg6[%c0_13, %c0_14], %10 {strides = array<i32>} : memref<8x1xf32, #tpu.memory_space<vmem>>, vector<8x1xf32>,
    %c32_i32 = arith.constant 32 : i32
    %23 = arith.muli %arg1, %c32_i32 : i32
    %24 = vector.broadcast %23 : i32 to vector<8x1xi32>
    %25 = arith.subi %4, %24 : vector<8x1xi32>
    %26 = vector.broadcast %6 : vector<1x32xi32> to vector<8x32xi32>
    %27 = vector.broadcast %25 : vector<8x1xi32> to vector<8x32xi32>
    %28 = arith.cmpi eq, %26, %27 : vector<8x32xi32>
    %c0_15 = arith.constant 0 : index
    %c0_16 = arith.constant 0 : index
    %29 = vector.load %arg8[%c0_15, %c0_16] : memref<8x1xf32, #tpu.memory_space<vmem>>, vector<8x1xf32>
    %cst_17 = arith.constant 0.000000e+00 : f32
    %30 = vector.shape_cast %5 : vector<1x32xf32> to vector<1x32xf32>
    %31 = vector.broadcast %30 : vector<1x32xf32> to vector<8x32xf32>
    %32 = vector.broadcast %cst_17 : f32 to vector<8x32xf32>
    %33 = arith.select %28, %31, %32 : vector<8x32xi1>, vector<8x32xf32>
    %cst_18 = arith.constant dense<0.000000e+00> : vector<8xf32>
    %34 = vector.multi_reduction <add>, %33, %cst_18 [1] : vector<8x32xf32> to vector<8xf32>
    %35 = vector.shape_cast %34 : vector<8xf32> to vector<8x1xf32>
    %36 = arith.addf %29, %35 : vector<8x1xf32>
    %c0_19 = arith.constant 0 : index
    %c0_20 = arith.constant 0 : index
    %37 = vector.load %arg8[%c0_19, %c0_20] : memref<8x1xf32, #tpu.memory_space<vmem>>, vector<8x1xf32>
    tpu.vector_store %arg8[%c0_19, %c0_20], %36 {strides = array<i32>} : memref<8x1xf32, #tpu.memory_space<vmem>>, vector<8x1xf32>,
    %c0_21 = arith.constant 0 : index
    %c0_22 = arith.constant 0 : index
    %38 = vector.load %arg9[%c0_21, %c0_22] : memref<8x1xf32, #tpu.memory_space<vmem>>, vector<8x1xf32>
    %cst_23 = arith.constant 0.000000e+00 : f32
    %39 = vector.broadcast %cst_23 : f32 to vector<8x32xf32>
    %40 = arith.select %28, %3, %39 : vector<8x32xi1>, vector<8x32xf32>
    %cst_24 = arith.constant dense<0.000000e+00> : vector<8xf32>
    %41 = vector.multi_reduction <add>, %40, %cst_24 [1] : vector<8x32xf32> to vector<8xf32>
    %42 = vector.shape_cast %41 : vector<8xf32> to vector<8x1xf32>
    %43 = arith.addf %38, %42 : vector<8x1xf32>
    %c0_25 = arith.constant 0 : index
    %c0_26 = arith.constant 0 : index
    %44 = vector.load %arg9[%c0_25, %c0_26] : memref<8x1xf32, #tpu.memory_space<vmem>>, vector<8x1xf32>
    tpu.vector_store %arg9[%c0_25, %c0_26], %43 {strides = array<i32>} : memref<8x1xf32, #tpu.memory_space<vmem>>, vector<8x1xf32>,
    %c0_i32_27 = arith.constant 0 : i32
    %45 = arith.cmpi eq, %arg1, %c0_i32_27 : i32
    %46 = arith.extui %45 : i1 to i32
    %c0_i32_28 = arith.constant 0 : i32
    %47 = arith.cmpi ne, %46, %c0_i32_28 : i32
    scf.if %47 {
      %c0_29 = arith.constant 0 : index
      %c0_30 = arith.constant 0 : index
      %48 = vector.load %arg6[%c0_29, %c0_30] : memref<8x1xf32, #tpu.memory_space<vmem>>, vector<8x1xf32>
      %c0_31 = arith.constant 0 : index
      %c0_32 = arith.constant 0 : index
      %49 = vector.load %arg7[%c0_31, %c0_32] : memref<8x1xf32, #tpu.memory_space<vmem>>, vector<8x1xf32>
      %50 = math.log %49 : vector<8x1xf32>
      %51 = arith.addf %48, %50 : vector<8x1xf32>
      %c8_i32 = arith.constant 8 : i32
      %52 = arith.muli %arg0, %c8_i32 : i32
      %53 = tpu.iota {dimensions = array<i32: 0>} : vector<8x1xi32>
      %54 = vector.broadcast %52 : i32 to vector<8x1xi32>
      %55 = arith.addi %54, %53 : vector<8x1xi32>
      %c8_i32_33 = arith.constant 8 : i32
      %56 = vector.broadcast %c8_i32_33 : i32 to vector<8x1xi32>
      %57 = arith.cmpi slt, %55, %56 : vector<8x1xi32>
      %c0_34 = arith.constant 0 : index
      %c0_35 = arith.constant 0 : index
      %58 = vector.load %arg8[%c0_34, %c0_35] : memref<8x1xf32, #tpu.memory_space<vmem>>, vector<8x1xf32>
      %c0_36 = arith.constant 0 : index
      %c0_37 = arith.constant 0 : index
      %59 = vector.load %arg9[%c0_36, %c0_37] : memref<8x1xf32, #tpu.memory_space<vmem>>, vector<8x1xf32>
      %60 = arith.subf %51, %59 : vector<8x1xf32>
      %61 = arith.mulf %58, %60 : vector<8x1xf32>
      %cst_38 = arith.constant 0.000000e+00 : f32
      %62 = vector.broadcast %cst_38 : f32 to vector<8x1xf32>
      %63 = arith.select %57, %61, %62 : vector<8x1xi1>, vector<8x1xf32>
      %64 = vector.shape_cast %63 : vector<8x1xf32> to vector<1x8x1xf32>
      %cst_39 = arith.constant dense<0.000000e+00> : vector<1xf32>
      %65 = vector.multi_reduction <add>, %64, %cst_39 [1, 2] : vector<1x8x1xf32> to vector<1xf32>
      %66 = vector.shape_cast %65 : vector<1xf32> to vector<1x1x1xf32>
      %67 = vector.extract %66[0, 0, 0] : f32 from vector<1x1x1xf32>
      %c0_40 = arith.constant 0 : index
      %c0_41 = arith.constant 0 : index
      %68 = vector.load %arg8[%c0_40, %c0_41] : memref<8x1xf32, #tpu.memory_space<vmem>>, vector<8x1xf32>
      %cst_42 = arith.constant 0.000000e+00 : f32
      %69 = vector.broadcast %cst_42 : f32 to vector<8x1xf32>
      %70 = arith.select %57, %68, %69 : vector<8x1xi1>, vector<8x1xf32>
      %71 = vector.shape_cast %70 : vector<8x1xf32> to vector<1x8x1xf32>
      %cst_43 = arith.constant dense<0.000000e+00> : vector<1xf32>
      %72 = vector.multi_reduction <add>, %71, %cst_43 [1, 2] : vector<1x8x1xf32> to vector<1xf32>
      %73 = vector.shape_cast %72 : vector<1xf32> to vector<1x1x1xf32>
      %74 = vector.extract %73[0, 0, 0] : f32 from vector<1x1x1xf32>
      %75 = tpu.iota {dimensions = array<i32: 2>} : vector<1x8x128xi32>
      %76 = tpu.iota {dimensions = array<i32: 1>} : vector<1x8x128xi32>
      %c0_i32_44 = arith.constant 0 : i32
      %77 = vector.broadcast %c0_i32_44 : i32 to vector<1x8x128xi32>
      %78 = arith.cmpi eq, %76, %77 : vector<1x8x128xi32>
      %c0_i32_45 = arith.constant 0 : i32
      %79 = vector.broadcast %c0_i32_45 : i32 to vector<1x8x128xi32>
      %80 = arith.cmpi eq, %75, %79 : vector<1x8x128xi32>
      %81 = arith.andi %78, %80 : vector<1x8x128xi1>
      %c0_i32_46 = arith.constant 0 : i32
      %82 = vector.broadcast %c0_i32_46 : i32 to vector<1x8x128xi32>
      %83 = arith.cmpi eq, %76, %82 : vector<1x8x128xi32>
      %c1_i32 = arith.constant 1 : i32
      %84 = vector.broadcast %c1_i32 : i32 to vector<1x8x128xi32>
      %85 = arith.cmpi eq, %75, %84 : vector<1x8x128xi32>
      %86 = arith.andi %83, %85 : vector<1x8x128xi1>
      %cst_47 = arith.constant 0.000000e+00 : f32
      %87 = vector.broadcast %74 : f32 to vector<1x8x128xf32>
      %88 = vector.broadcast %cst_47 : f32 to vector<1x8x128xf32>
      %89 = arith.select %86, %87, %88 : vector<1x8x128xi1>, vector<1x8x128xf32>
      %90 = vector.broadcast %67 : f32 to vector<1x8x128xf32>
      %91 = arith.select %81, %90, %89 : vector<1x8x128xi1>, vector<1x8x128xf32>
      %c0_48 = arith.constant 0 : index
      %c0_49 = arith.constant 0 : index
      %c0_50 = arith.constant 0 : index
      %92 = vector.load %arg5[%c0_48, %c0_49, %c0_50] : memref<1x8x128xf32, #tpu.memory_space<vmem>>, vector<1x8x128xf32>
      tpu.vector_store %arg5[%c0_48, %c0_49, %c0_50], %91 {strides = array<i32>} : memref<1x8x128xf32, #tpu.memory_space<vmem>>, vector<1x8x128xf32>,
    } else {
    }
    return
  }
  func.func @transform_0(%arg0: i32, %arg1: i32) -> (i32, i32) {
    %c0_i32 = arith.constant 0 : i32
    return %arg0, %arg1 : i32, i32
  }
  func.func @transform_1(%arg0: i32, %arg1: i32) -> (i32, i32) {
    %c0_i32 = arith.constant 0 : i32
    %c0_i32_0 = arith.constant 0 : i32
    return %arg0, %c0_i32 : i32, i32
  }
  func.func @transform_2(%arg0: i32, %arg1: i32) -> (i32, i32) {
    %c0_i32 = arith.constant 0 : i32
    %c0_i32_0 = arith.constant 0 : i32
    return %c0_i32, %arg1 : i32, i32
  }
  func.func @transform_3(%arg0: i32, %arg1: i32) -> (i32, i32, i32) {
    %c0_i32 = arith.constant 0 : i32
    %c0_i32_0 = arith.constant 0 : i32
    %c0_i32_1 = arith.constant 0 : i32
    return %arg0, %c0_i32, %c0_i32_0 : i32, i32, i32
  }
}

</mosaic_0001>

<bundles_post_ra>
// kernel: tpu_custom_call.1
= control target key start
LH: loop header
LB: loop body
LE: loop exit
PB: predicated region body
PF: predicated region fallthrough
CT: control target
= control target key end

     0   :  { %vm29_vm0 = vcmask 261120   ;;  %s240_s0 = inlined_call_operand.vmem [shape: f32[8,32], index: 0, kind: input, shape index: {}]   ;;  %s241_s1 = inlined_call_operand.vmem [shape: s32[8,1], index: 1, kind: input, shape index: {}]   ;;  %s242_s2 = inlined_call_operand.vmem [shape: f32[1,32], index: 2, kind: input, shape index: {}]   ;;  %s243_s3 = inlined_call_operand.hbm [shape: f32[1,8,128], index: 3, kind: output, shape index: {}]  }
   0x1   :  { %v24_v0 = vld [vmem:[%s240_s0] sm:$0xff] }
   0x2   :  { %8 = vsyncpa [#allocation7], 0  ;;  %v30_v1 = vsel %vm29_vm0, %v24_v0, -inf  ;;  %vm19_vm1 = vcmask 7168   ;;  %v185_v2 = vmov -inf   ;;  %v186_v3 = vmov 0  }
   0x3   :  { %31 = vmax.xlane.f32.xlu0 %v30_v1  ;;  %20 = vst.msk [vmem:[#allocation2] sm:$0xff] %vm19_vm1, %v185_v2  ;;  %156 = vset.pattern.permute.xlu1 %v186_v3  ;;  %v25_v4 = vld [vmem:[%s241_s1] sm:$0xff]  ;;  %v187_v5 = vmov 0.0   ;;  %v27_v13 = vlaneseq  ;;  %s188_s16 = smov [#allocation6]  }
   0x4   :  { %155 = vset.pattern.permute.xlu0 %v186_v3  ;;  %59 = vperm.xlu1 %156, %v25_v4   ;;  %21 = vst.msk [vmem:[#allocation3] sm:$0xff] %vm19_vm1, %v187_v5  ;;  %22 = vst.msk [vmem:[#allocation4] sm:$0xff] %vm19_vm1, %v187_v5  ;;  %v146_v19 = vld [vmem:[%s242_s2] ss:$0 sm:$0xff]  ;;  %s138_s17 = sshll.u32 %s188_s16, 4  ;;  %s139_s17 = int_to_ptr.vmem [resolvable:$true] %s138_s17 }
   0x5   :  { %23 = vst.msk [vmem:[#allocation5] sm:$0xff] %vm19_vm1, %v187_v5  ;;  %v221_v14 = vand.u32 127, %v27_v13  ;;  %v92_v60 = vshrl.u32 %v27_v13, 7  ;;  %s163_s19 = scalar_lea.vmem %s139_s17, 128  ;;  %p168_p1 = scmp.lt.s32.totalorder %s139_s17, %s139_s17 }
   0x6   :  { %p164_p0 = scmp.ne.s32.totalorder %s139_s17, %s163_s19  ;;  %p169_p2 = scmp.lt.s32.totalorder %s163_s19, %s163_s19 }
   0x7   :  { %vm122_vm3 = vcmp.eq.s32.totalorder %v92_v60, 0  ;;  %vm125_vm4 = vcmp.eq.s32.totalorder %v221_v14, 1  ;;  %vm123_vm5 = vcmp.eq.s32.totalorder %v221_v14, 0 }
   0x8   :  { %vm126_vm6 = vmand %vm122_vm3, %vm125_vm4  ;;  %p170_p3 = por %p169_p2, %p168_p1 }
   0x9   :  { %vm124_vm7 = vmand %vm122_vm3, %vm123_vm5 }
   0xa   :  { %v33_v6 = vld [vmem:[#allocation2] sm:$0xff]  ;;  %p171_p4 = pnand %p170_p3, %p164_p0 }
   0xb   :  { %v35_v25 = vld [vmem:[#allocation3] sm:$0xff]  ;;  %v62_v32 = vld [vmem:[#allocation4] sm:$0xff] }
   0xc   :  { %v75_v29 = vld [vmem:[#allocation5] sm:$0xff] }
  0x7f   :  { %v60_v15 = vpop.permute.xlu1 %59 }
  0x80   :  { %vm61_vm2 = vcmp.eq.s32.totalorder %v221_v14, %v60_v15 }
  0x81   :  { %v76_v17 = vsel %vm61_vm2, %v24_v0, 0.0  ;;  %v69_v21 = vsel %vm61_vm2, %v146_v19, 0.0 }
  0x82   :  { %v77_v20 = vsel %vm29_vm0, %v76_v17, 0.0  ;;  %v70_v22 = vsel %vm29_vm0, %v69_v21, 0.0 }
  0x8c   :  { %v32_v7 = vpop.xlane.xlu0 %31 }
  0x8d   :  { %v34_v8 = vmax.f32 %v33_v6, %v32_v7 }
  0x8f   :  { %v36_v9 = vsub.f32 %v33_v6, %v34_v8  ;;  %54 = vst.msk [vmem:[#allocation2] sm:$0xff] %vm19_vm1, %v34_v8  ;;  %42 = vperm.xlu0 %155, %v34_v8  }
  0x91   :  { %v37_v23 = vmul.f32 1.442695, %v36_v9 }
  0x96   :  { %v85_v40 = vld [vmem:[#allocation2] sm:$0xff] }
 0x10a   :  { %v43_v10 = vpop.permute.xlu0 %42 }
 0x10b   :  { %v45_v11 = vsub.f32 %v24_v0, %v43_v10 }
 0x10d   :  { %v46_v12 = vmul.f32 1.442695, %v45_v11 }
 0x10f   :  { %157 = vpow2.f32 %v46_v12 }
 0x110   :  { %159 = vpow2.f32 %v37_v23 }
 0x11c   :  { %v158_v16 = vpop.eup %157 }
 0x11d   :  { %v48_v18 = vsel %vm29_vm0, %v158_v16, 0.0  ;;  %v160_v24 = vpop.eup %159 }
 0x11e   :  { %49 = vadd.xlane.f32.xlu1 %v48_v18  ;;  %v39_v26 = vmul.f32 %v160_v24, %v35_v25 }
 0x122   :  { %78 = vadd.xlane.f32.xlu1 %v77_v20 }
 0x126   :  { %71 = vadd.xlane.f32.xlu1 %v70_v22 }
 0x1a7   :  { %v50_v27 = vpop.xlane.xlu1 %49 }
 0x1a8   :  { %v51_v28 = vadd.f32 %v50_v27, %v39_v26 }
 0x1aa   :  { %53 = vst.msk [vmem:[#allocation3] sm:$0xff] %vm19_vm1, %v51_v28 }
 0x1ab   :  { %v79_v30 = vpop.xlane.xlu1 %78 }
 0x1ac   :  { %v80_v31 = vadd.f32 %v79_v30, %v75_v29 }
 0x1ae   :  { %81 = vst.msk [vmem:[#allocation5] sm:$0xff] %vm19_vm1, %v80_v31 }
 0x1af   :  { %v72_v33 = vpop.xlane.xlu1 %71 }
 0x1b0   :  { %v73_v34 = vadd.f32 %v72_v33, %v62_v32 }
 0x1b1   :  { %v86_v35 = vld [vmem:[#allocation3] sm:$0xff] }
 0x1b2   :  { %74 = vst.msk [vmem:[#allocation4] sm:$0xff] %vm19_vm1, %v73_v34  ;;  %161 = vlog2.f32 %v86_v35 }
 0x1b5   :  { %v97_v42 = vld [vmem:[#allocation5] sm:$0xff] }
 0x1b9   :  { %v96_v36 = vld [vmem:[#allocation4] sm:$0xff] }
 0x1ba   :  { %v112_v37 = vsel %vm19_vm1, %v96_v36, 0.0 }
 0x1bb   :  { %113 = vadd.xlane.f32.xlu1 %v112_v37 }
 0x1bf   :  { %v162_v38 = vpop.eup %161 }
 0x1c0   :  { %v88_v39 = vmul.f32 0.6931472, %v162_v38 }
 0x1c2   :  { %v89_v41 = vadd.f32 %v88_v39, %v85_v40 }
 0x1c4   :  { %v98_v43 = vsub.f32 %v89_v41, %v97_v42 }
 0x1c6   :  { %v99_v44 = vmul.f32 %v98_v43, %v96_v36 }
 0x1c8   :  { %v101_v45 = vsel %vm19_vm1, %v99_v44, 0.0 }
 0x1c9   :  { %102 = vadd.xlane.f32.xlu0 %v101_v45 }
 0x244   :  { %v114_v46 = vpop.xlane.xlu1 %113 }
 0x245   :  { %v115_v47 = vrot.slane %v114_v46, 4 }
 0x247   :  { %v116_v48 = vadd.f32 %v115_v47, %v114_v46 }
 0x249   :  { %v117_v49 = vrot.slane %v116_v48, 2 }
 0x24b   :  { %v118_v53 = vadd.f32 %v117_v49, %v116_v48 }
 0x24d   :  { %v119_v56 = vrot.slane %v118_v53, 1 }
 0x24f   :  { %v120_v59 = vadd.f32 %v119_v56, %v118_v53 }
 0x252   :  { %v103_v50 = vpop.xlane.xlu0 %102 }
 0x253   :  { %v104_v51 = vrot.slane %v103_v50, 4 }
 0x255   :  { %v105_v52 = vadd.f32 %v104_v51, %v103_v50 }
 0x257   :  { %v106_v54 = vrot.slane %v105_v52, 2 }
 0x259   :  { %v107_v55 = vadd.f32 %v106_v54, %v105_v52 }
 0x25b   :  { %v108_v57 = vrot.slane %v107_v55, 1 }
 0x25d   :  { %v109_v58 = vadd.f32 %v108_v57, %v107_v55 }
 0x25f   :  { %147 = vpush %v109_v58 }
 0x260   :  { %149 = vpush %v120_v59 }
 0x290   :  { %s148_s2 = spop %147 }
 0x291   :  { %v129_v61 = vstv %s148_s2  ;;  %s150_s18 = spop %149 }
 0x292   :  { %v127_v62 = vstv %s150_s18 }
 0x293   :  { %v128_v63 = vsel %vm126_vm6, %v127_v62, 0.0 }
 0x294   :  { %v130_v0 = vsel %vm124_vm7, %v129_v61, %v128_v63 }
 0x295   :  { %131 = vst [vmem:[#allocation6] sm:$0xff] %v130_v0 }
 0x296   :  { %174 = shalt.err (!%p171_p4)
}
 0x297   :  { %141 = dma.vmem_to_hbm [thread:$0]  %s139_s17, 128, %s243_s3, [#allocation7]  }
 0x298   :  { %183 = dma.done.wait [#allocation7], 128  }
 0x299   :  { %184 = vsyncadd [#allocation7], 4294967168 }
 0x29a   :  { %145 = vsyncpa [#allocation7], 1 }

</bundles_post_ra>
